<compile_context>
chip_gen: v6e
topology: v6e:2x2x1
jax: 0.10.0
libtpu: 0.0.40
codegen_flags: <defaults>
</compile_context>

<pallas_src>
import functools
import math

import jax
import jax.numpy as jnp
from jax import lax
from jax.experimental import pallas as pl
from jax.experimental.pallas import tpu as pltpu


_SQRT_HALF = 0.7071067811865476


def _round_up(x, m):
    return ((x + m - 1) // m) * m


def _erf_approx(x):
    """Abramowitz & Stegun 7.1.26 erf approximation, |error| <= 1.5e-7 (f32)."""
    a1 = 0.254829592
    a2 = -0.284496736
    a3 = 1.421413741
    a4 = -1.453152027
    a5 = 1.061405429
    p = 0.3275911
    sgn = jnp.where(x >= 0.0, 1.0, -1.0).astype(jnp.float32)
    ax = jnp.abs(x)
    t = 1.0 / (1.0 + p * ax)
    poly = ((((a5 * t + a4) * t + a3) * t + a2) * t + a1) * t
    y = 1.0 - poly * jnp.exp(-ax * ax)
    return sgn * y


def _gelu_exact(x):
    """Exact (erf-based) GELU, matching torch.nn.functional.gelu default."""
    return 0.5 * x * (1.0 + _erf_approx(x * _SQRT_HALF))


def _feedforward_kernel(x_ref, w1_ref, g_ref, w2_ref, o_ref, *, eps):
    """One row-tile of the fused FeedForward.

    x_ref:  VMEM [tm, dim]
    w1_ref: VMEM [dim, 2*inner]   (resident across grid)
    g_ref:  VMEM [1, inner]       (LayerNorm gain, resident)
    w2_ref: VMEM [inner, dim]     (resident)
    o_ref:  VMEM [tm, dim]
    """
    inner = w2_ref.shape[0]

    x = x_ref[...]
    w1 = w1_ref[...]
    # First projection: [tm, dim] @ [dim, 2*inner] -> f32 accumulate on MXU.
    h = jnp.dot(x, w1, preferred_element_type=jnp.float32)

    # GEGLU: first half is the value path, second half is the gate.
    v = h[:, :inner]
    gate = h[:, inner:]
    a = v * _gelu_exact(gate)

    # LayerNorm (no bias, biased variance) with learned gain.
    mean = jnp.mean(a, axis=-1, keepdims=True)
    var = jnp.mean(jnp.square(a - mean), axis=-1, keepdims=True)
    ln = (a - mean) * lax.rsqrt(var + eps) * g_ref[...].astype(jnp.float32)

    # TODO(synk): nn.Dropout with p > 0 in training mode is not implemented
    # (module default p = 0.0 -> identity).

    w2 = w2_ref[...]
    out = jnp.dot(ln.astype(w2.dtype), w2, preferred_element_type=jnp.float32)
    o_ref[...] = out.astype(o_ref.dtype)


def feedforward(x, w1, gain, w2, *, block_m=128):
    """JAX/Pallas equivalent of FeedForward.forward (inference / dropout=0).

    x:    [..., dim]
    w1:   [dim, 2*inner]   (= torch Linear(dim, 2*inner).weight.T)
    gain: [inner]          (= LayerNorm.g)
    w2:   [inner, dim]     (= torch Linear(inner, dim).weight.T)
    """
    orig_shape = x.shape
    dim = orig_shape[-1]
    two_inner = w1.shape[1]
    inner = two_inner // 2
    assert w1.shape == (dim, two_inner)
    assert w2.shape == (inner, dim)
    assert gain.shape == (inner,)

    eps = 1e-5 if x.dtype == jnp.float32 else 1e-3
    itemsize = jnp.dtype(x.dtype).itemsize

    x2 = x.reshape(-1, dim)
    m = x2.shape[0]

    # Row tile: multiple of 8 sublanes, capped at block_m; pad rows so the
    # grid divides evenly (padded rows are computed independently & dropped).
    tm = min(block_m, _round_up(m, 8))
    m_pad = _round_up(m, tm)
    if m_pad != m:
        x2 = jnp.pad(x2, ((0, m_pad - m), (0, 0)))

    gain2 = gain.reshape(1, inner)

    weight_bytes = (w1.size + w2.size) * itemsize
    vmem_limit = int(min(64 * 1024 * 1024,
                         max(32 * 1024 * 1024, 6 * weight_bytes)))

    kernel = functools.partial(_feedforward_kernel, eps=eps)

    cost = pl.CostEstimate(
        flops=int(6 * m_pad * dim * inner),            # 2*M*D*2I + 2*M*I*D
        transcendentals=int(m_pad * inner),            # one exp per gate elem
        bytes_accessed=int((2 * m_pad * dim + dim * two_inner
                            + inner * dim + inner) * itemsize),
    )

    out = pl.pallas_call(
        kernel,
        out_shape=jax.ShapeDtypeStruct((m_pad, dim), x.dtype),
        grid_spec=pltpu.PrefetchScalarGridSpec(
            num_scalar_prefetch=0,
            grid=(m_pad // tm,),
            in_specs=[
                pl.BlockSpec((tm, dim), lambda i: (i, 0)),          # x tile
                pl.BlockSpec((dim, two_inner), lambda i: (0, 0)),   # W1 (resident)
                pl.BlockSpec((1, inner), lambda i: (0, 0)),         # LN gain
                pl.BlockSpec((inner, dim), lambda i: (0, 0)),       # W2 (resident)
            ],
            out_specs=pl.BlockSpec((tm, dim), lambda i: (i, 0)),
        ),
        compiler_params=pltpu.CompilerParams(
            dimension_semantics=("parallel",),
            vmem_limit_bytes=vmem_limit,
        ),
        cost_estimate=cost,
    )(x2, w1, gain2, w2)

    return out[:m].reshape(orig_shape)


def _feedforward_reference(x, w1, gain, w2):
    """Pure-JAX reference (uses true erf-based GELU)."""
    eps = 1e-5 if x.dtype == jnp.float32 else 1e-3
    h = jnp.einsum("...d,df->...f", x, w1)
    v, gate = jnp.split(h, 2, axis=-1)
    a = v * jax.nn.gelu(gate, approximate=False)
    mean = jnp.mean(a, axis=-1, keepdims=True)
    var = jnp.mean(jnp.square(a - mean), axis=-1, keepdims=True)
    ln = (a - mean) * lax.rsqrt(var + eps) * gain
    return jnp.einsum("...f,fd->...d", ln, w2)


if __name__ == "__main__":
    key = jax.random.PRNGKey(0)
    k_x, k_w1, k_w2, k_g = jax.random.split(key, 4)

    # Small shapes consistent with the module: x is [batch, seq, dim].
    batch, seq, dim, mult = 2, 8, 32, 4
    inner = dim * mult

    x = jax.random.normal(k_x, (batch, seq, dim), dtype=jnp.float32)
    w1 = jax.random.normal(k_w1, (dim, 2 * inner), dtype=jnp.float32) / math.sqrt(dim)
    w2 = jax.random.normal(k_w2, (inner, dim), dtype=jnp.float32) / math.sqrt(inner)
    gain = 1.0 + 0.1 * jax.random.normal(k_g, (inner,), dtype=jnp.float32)

    out = feedforward(x, w1, gain, w2)
    out = jax.block_until_ready(out)

    ref = _feedforward_reference(x, w1, gain, w2)
    assert out.shape == x.shape
    max_err = float(jnp.max(jnp.abs(out - ref)))
    assert jnp.allclose(out, ref, atol=2e-4, rtol=2e-4), (
        f"Pallas FeedForward mismatch vs reference (max abs err {max_err})")

    print("KERNEL_OK")
</pallas_src>

<mosaic_0001>
module attributes {stable_mosaic.version = 11 : i64} {
  func.func @_feedforward_kernel(%arg0: i32, %arg1: memref<16x32xf32, #tpu.memory_space<vmem>>, %arg2: memref<32x256xf32, #tpu.memory_space<vmem>>, %arg3: memref<1x128xf32, #tpu.memory_space<vmem>>, %arg4: memref<128x32xf32, #tpu.memory_space<vmem>>, %arg5: memref<16x32xf32, #tpu.memory_space<vmem>>) attributes {dimension_semantics = [#tpu.dimension_semantics<parallel>], iteration_bounds = array<i64: 1>, scalar_prefetch = 0 : i64, scratch_operands = 0 : i64, tpu.core_type = #tpu.core_type<tc>, window_params = [{transform_indices = @transform_0, window_bounds = array<i64: 16, 32>}, {pipeline_mode = #tpu.pipeline_mode<synchronous>, transform_indices = @transform_1, window_bounds = array<i64: 32, 256>}, {pipeline_mode = #tpu.pipeline_mode<synchronous>, transform_indices = @transform_2, window_bounds = array<i64: 1, 128>}, {pipeline_mode = #tpu.pipeline_mode<synchronous>, transform_indices = @transform_3, window_bounds = array<i64: 128, 32>}, {transform_indices = @transform_4, window_bounds = array<i64: 16, 32>}]} {
    %c0 = arith.constant 0 : index
    %c0_0 = arith.constant 0 : index
    %0 = vector.load %arg1[%c0, %c0_0] : memref<16x32xf32, #tpu.memory_space<vmem>>, vector<16x32xf32>
    %c0_1 = arith.constant 0 : index
    %c0_2 = arith.constant 0 : index
    %1 = vector.load %arg2[%c0_1, %c0_2] : memref<32x256xf32, #tpu.memory_space<vmem>>, vector<32x256xf32>
    %cst = arith.constant dense<0.000000e+00> : vector<16x256xf32>
    %2 = tpu.matmul %0, %1, %cst {dimension_numbers = #tpu.dot_dimension_numbers<[1], [0], [0], [1], [0, 0, 1, 1], [], []>} : vector<16x32xf32>, vector<32x256xf32>, vector<16x256xf32> -> vector<16x256xf32>
    %3 = vector.extract_strided_slice %2 {offsets = [0, 0], sizes = [16, 128], strides = [1, 1]} : vector<16x256xf32> to vector<16x128xf32>
    %4 = vector.extract_strided_slice %2 {offsets = [0, 128], sizes = [16, 128], strides = [1, 1]} : vector<16x256xf32> to vector<16x128xf32>
    %cst_3 = arith.constant 5.000000e-01 : f32
    %5 = vector.broadcast %cst_3 : f32 to vector<16x128xf32>
    %6 = arith.mulf %5, %4 : vector<16x128xf32>
    %cst_4 = arith.constant 0.707106769 : f32
    %7 = vector.broadcast %cst_4 : f32 to vector<16x128xf32>
    %8 = arith.mulf %4, %7 : vector<16x128xf32>
    %cst_5 = arith.constant 0.000000e+00 : f32
    %9 = vector.broadcast %cst_5 : f32 to vector<16x128xf32>
    %10 = arith.cmpf oge, %8, %9 : vector<16x128xf32>
    %cst_6 = arith.constant 1.000000e+00 : f32
    %cst_7 = arith.constant -1.000000e+00 : f32
    %11 = vector.broadcast %cst_6 : f32 to vector<16x128xf32>
    %12 = vector.broadcast %cst_7 : f32 to vector<16x128xf32>
    %13 = arith.select %10, %11, %12 : vector<16x128xi1>, vector<16x128xf32>
    %14 = math.absf %8 : vector<16x128xf32>
    %cst_8 = arith.constant 0.327591091 : f32
    %15 = vector.broadcast %cst_8 : f32 to vector<16x128xf32>
    %16 = arith.mulf %15, %14 : vector<16x128xf32>
    %cst_9 = arith.constant 1.000000e+00 : f32
    %17 = vector.broadcast %cst_9 : f32 to vector<16x128xf32>
    %18 = arith.addf %17, %16 : vector<16x128xf32>
    %cst_10 = arith.constant 1.000000e+00 : f32
    %19 = vector.broadcast %cst_10 : f32 to vector<16x128xf32>
    %20 = arith.divf %19, %18 : vector<16x128xf32>
    %cst_11 = arith.constant 1.06140542 : f32
    %21 = vector.broadcast %cst_11 : f32 to vector<16x128xf32>
    %22 = arith.mulf %21, %20 : vector<16x128xf32>
    %cst_12 = arith.constant -1.45315206 : f32
    %23 = vector.broadcast %cst_12 : f32 to vector<16x128xf32>
    %24 = arith.addf %22, %23 : vector<16x128xf32>
    %25 = arith.mulf %24, %20 : vector<16x128xf32>
    %cst_13 = arith.constant 1.42141378 : f32
    %26 = vector.broadcast %cst_13 : f32 to vector<16x128xf32>
    %27 = arith.addf %25, %26 : vector<16x128xf32>
    %28 = arith.mulf %27, %20 : vector<16x128xf32>
    %cst_14 = arith.constant -0.284496725 : f32
    %29 = vector.broadcast %cst_14 : f32 to vector<16x128xf32>
    %30 = arith.addf %28, %29 : vector<16x128xf32>
    %31 = arith.mulf %30, %20 : vector<16x128xf32>
    %cst_15 = arith.constant 0.254829586 : f32
    %32 = vector.broadcast %cst_15 : f32 to vector<16x128xf32>
    %33 = arith.addf %31, %32 : vector<16x128xf32>
    %34 = arith.mulf %33, %20 : vector<16x128xf32>
    %cst_16 = arith.constant 0.000000e+00 : f32
    %35 = vector.broadcast %cst_16 : f32 to vector<16x128xf32>
    %36 = arith.subf %35, %14 : vector<16x128xf32>
    %37 = arith.mulf %36, %14 : vector<16x128xf32>
    %38 = math.exp %37 : vector<16x128xf32>
    %39 = arith.mulf %34, %38 : vector<16x128xf32>
    %cst_17 = arith.constant 1.000000e+00 : f32
    %40 = vector.broadcast %cst_17 : f32 to vector<16x128xf32>
    %41 = arith.subf %40, %39 : vector<16x128xf32>
    %42 = arith.mulf %13, %41 : vector<16x128xf32>
    %cst_18 = arith.constant 1.000000e+00 : f32
    %43 = vector.broadcast %cst_18 : f32 to vector<16x128xf32>
    %44 = arith.addf %43, %42 : vector<16x128xf32>
    %45 = arith.mulf %6, %44 : vector<16x128xf32>
    %46 = arith.mulf %3, %45 : vector<16x128xf32>
    %cst_19 = arith.constant dense<0.000000e+00> : vector<16xf32>
    %47 = vector.multi_reduction <add>, %46, %cst_19 [1] : vector<16x128xf32> to vector<16xf32>
    %48 = vector.shape_cast %47 : vector<16xf32> to vector<16x1xf32>
    %cst_20 = arith.constant 1.280000e+02 : f32
    %49 = vector.broadcast %cst_20 : f32 to vector<16x1xf32>
    %50 = arith.divf %48, %49 : vector<16x1xf32>
    %51 = vector.broadcast %50 : vector<16x1xf32> to vector<16x128xf32>
    %52 = arith.subf %46, %51 : vector<16x128xf32>
    %53 = arith.mulf %52, %52 : vector<16x128xf32>
    %cst_21 = arith.constant dense<0.000000e+00> : vector<16xf32>
    %54 = vector.multi_reduction <add>, %53, %cst_21 [1] : vector<16x128xf32> to vector<16xf32>
    %55 = vector.shape_cast %54 : vector<16xf32> to vector<16x1xf32>
    %cst_22 = arith.constant 1.280000e+02 : f32
    %56 = vector.broadcast %cst_22 : f32 to vector<16x1xf32>
    %57 = arith.divf %55, %56 : vector<16x1xf32>
    %58 = vector.broadcast %50 : vector<16x1xf32> to vector<16x128xf32>
    %59 = arith.subf %46, %58 : vector<16x128xf32>
    %cst_23 = arith.constant 9.99999974E-6 : f32
    %60 = vector.broadcast %cst_23 : f32 to vector<16x1xf32>
    %61 = arith.addf %57, %60 : vector<16x1xf32>
    %62 = math.rsqrt %61 : vector<16x1xf32>
    %63 = vector.broadcast %62 : vector<16x1xf32> to vector<16x128xf32>
    %64 = arith.mulf %59, %63 : vector<16x128xf32>
    %c0_24 = arith.constant 0 : index
    %c0_25 = arith.constant 0 : index
    %65 = vector.load %arg3[%c0_24, %c0_25] : memref<1x128xf32, #tpu.memory_space<vmem>>, vector<1x128xf32>
    %66 = vector.broadcast %65 : vector<1x128xf32> to vector<16x128xf32>
    %67 = arith.mulf %64, %66 : vector<16x128xf32>
    %c0_26 = arith.constant 0 : index
    %c0_27 = arith.constant 0 : index
    %68 = vector.load %arg4[%c0_26, %c0_27] : memref<128x32xf32, #tpu.memory_space<vmem>>, vector<128x32xf32>
    %cst_28 = arith.constant dense<0.000000e+00> : vector<16x32xf32>
    %69 = tpu.matmul %67, %68, %cst_28 {dimension_numbers = #tpu.dot_dimension_numbers<[1], [0], [0], [1], [0, 0, 1, 1], [], []>} : vector<16x128xf32>, vector<128x32xf32>, vector<16x32xf32> -> vector<16x32xf32>
    %c0_29 = arith.constant 0 : index
    %c0_30 = arith.constant 0 : index
    %70 = vector.load %arg5[%c0_29, %c0_30] : memref<16x32xf32, #tpu.memory_space<vmem>>, vector<16x32xf32>
    tpu.vector_store %arg5[%c0_29, %c0_30], %69 {strides = array<i32>} : memref<16x32xf32, #tpu.memory_space<vmem>>, vector<16x32xf32>,
    return
  }
  func.func @transform_0(%arg0: i32) -> (i32, i32) {
    %c0_i32 = arith.constant 0 : i32
    %c0_i32_0 = arith.constant 0 : i32
    return %arg0, %c0_i32 : i32, i32
  }
  func.func @transform_1(%arg0: i32) -> (i32, i32) {
    %c0_i32 = arith.constant 0 : i32
    %c0_i32_0 = arith.constant 0 : i32
    %c0_i32_1 = arith.constant 0 : i32
    return %c0_i32, %c0_i32_0 : i32, i32
  }
  func.func @transform_2(%arg0: i32) -> (i32, i32) {
    %c0_i32 = arith.constant 0 : i32
    %c0_i32_0 = arith.constant 0 : i32
    %c0_i32_1 = arith.constant 0 : i32
    return %c0_i32, %c0_i32_0 : i32, i32
  }
  func.func @transform_3(%arg0: i32) -> (i32, i32) {
    %c0_i32 = arith.constant 0 : i32
    %c0_i32_0 = arith.constant 0 : i32
    %c0_i32_1 = arith.constant 0 : i32
    return %c0_i32, %c0_i32_0 : i32, i32
  }
  func.func @transform_4(%arg0: i32) -> (i32, i32) {
    %c0_i32 = arith.constant 0 : i32
    %c0_i32_0 = arith.constant 0 : i32
    return %arg0, %c0_i32 : i32, i32
  }
}

</mosaic_0001>

<bundles_post_ra>
// kernel: tpu_custom_call.1
= control target key start
LH: loop header
LB: loop body
LE: loop exit
PB: predicated region body
PF: predicated region fallthrough
CT: control target
= control target key end

     0   :  { %v404_v4 = vmov 0.0   ;;  %s522_s0 = inlined_call_operand.vmem [shape: f32[16,32], index: 0, kind: input, shape index: {}]   ;;  %s523_s1 = inlined_call_operand.vmem [shape: f32[32,256], index: 1, kind: input, shape index: {}]   ;;  %s524_s2 = inlined_call_operand.vmem [shape: f32[1,128], index: 2, kind: input, shape index: {}]   ;;  %s525_s3 = inlined_call_operand.vmem [shape: f32[128,32], index: 3, kind: input, shape index: {}]   ;;  %s526_s4 = inlined_call_operand.hbm [shape: f32[16,32], index: 4, kind: output, shape index: {}]  }
   0x1   :  { %v27_v0 = vld [vmem:[%s523_s1 + $0x38] sm:$0xff]  ;;  %v26_v1 = vld [vmem:[%s523_s1 + $0x30] sm:$0xff]  ;;  %v25_v2 = vld [vmem:[%s523_s1 + $0x28] sm:$0xff]  ;;  %99 = vmatprep.mubr.f32.mxu0 %v404_v4 }
   0x2   :  { %59 = vmatprep.subr.mxu0 %v27_v0  ;;  %v24_v3 = vld [vmem:[%s523_s1 + $0x20] sm:$0xff]  ;;  %v23_v5 = vld [vmem:[%s523_s1 + $0x18] sm:$0xff]  ;;  %v22_v6 = vld [vmem:[%s523_s1 + $0x10] sm:$0xff] }
   0x3   :  { %60 = vmatpush1.msra.mxu0 %v26_v1 }
   0x4   :  { %61 = vmatprep.subr.mxu0 %v25_v2 }
   0x5   :  { %9 = vsyncpa [#allocation3], 0  ;;  %62 = vmatpush1.msra.mxu0 %v24_v3  ;;  %v21_v7 = vld [vmem:[%s523_s1 + $0x8] sm:$0xff]  ;;  %v20_v8 = vld [vmem:[%s523_s1] sm:$0xff]  ;;  %vm28_vm0 = vcmask 261120   ;;  %v405_v53 = vmov -1.0  }
   0x6   :  { %63 = vmatprep.subr.mxu0 %v23_v5  ;;  %v18_v9 = vld [vmem:[%s522_s0] sm:$0xff]  ;;  %v19_v10 = vld [vmem:[%s522_s0 + $0x8] sm:$0xff]  ;;  %v214_v5 = vld [vmem:[%s525_s3 + $0x70] sm:$0xff] }
   0x7   :  { %64 = vmatpush1.msra.mxu0 %v22_v6  ;;  %v213_v6 = vld [vmem:[%s525_s3 + $0x68] sm:$0xff] }
   0x8   :  { %65 = vmatprep.subr.mxu0 %v21_v7 }
   0x9   :  { %66 = vmatpush1.msra.mxu0 %v20_v8 }
   0xa   :  { %309 = vmatmul.mubr.msk.f32.vlgmr.msra.gmra.mxu0 %vm28_vm0, %v18_v9 }
   0xb   :  { %105 = vmatprep.mubr.f32.mxu0 %v404_v4  ;;  %v215_v4 = vld [vmem:[%s525_s3 + $0x78] sm:$0xff] }
   0xc   :  { %330 = vmatprep.subr.mxu1 %v215_v4 }
   0xd   :  { %331 = vmatpush3.msra.mxu1 %v215_v4 }
   0xe   :  { %310 = vmatmul.mubr.msk.f32.gmra.mxu0 %vm28_vm0, %v19_v10  ;;  %332 = vmatprep.subr.mxu1 %v214_v5 }
   0xf   :  { %333 = vmatpush3.msra.mxu1 %v214_v5 }
  0x10   :  { %334 = vmatprep.subr.mxu1 %v213_v6 }
  0x11   :  { %335 = vmatpush3.msra.mxu1 %v213_v6 }
  0xca   :  { %v101_v11 = vpop.f32.mrf.mxu0 }
  0xcc   :  { %v103_v12 = vpop.f32.mrf.mxu0 }
  0xcd   :  { %v114_v13 = vmul.f32 0.70710677, %v103_v12  ;;  %v112_v57 = vmul.f32 0.5, %v103_v12 }
  0xce   :  { %v107_v14 = vpop.f32.mrf.mxu0 }
  0xcf   :  { %v120_v15 = vand.u32 2147483647, %v114_v13  ;;  %vm116_vm1 = vcmp.ge.f32.partialorder %v114_v13, 0.0 }
  0xd0   :  { %v109_v16 = vpop.f32.mrf.mxu0  ;;  %v118_v54 = vsel %vm116_vm1, 1.0, %v405_v53 }
  0xd1   :  { %v122_v17 = vmul.f32 0.3275911, %v120_v15  ;;  %v115_v18 = vmul.f32 0.70710677, %v109_v16  ;;  %v148_v23 = vsub.f32 0.0, %v120_v15  ;;  %v113_v63 = vmul.f32 0.5, %v109_v16 }
  0xd2   :  { %v211_v16 = vld [vmem:[%s525_s3 + $0x58] sm:$0xff] }
  0xd3   :  { %v124_v19 = vadd.f32 1.0, %v122_v17  ;;  %v121_v20 = vand.u32 2147483647, %v115_v18  ;;  %v150_v24 = vmul.f32 %v148_v23, %v120_v15  ;;  %vm117_vm2 = vcmp.ge.f32.partialorder %v115_v18, 0.0  ;;  %v212_v15 = vld [vmem:[%s525_s3 + $0x60] sm:$0xff]  ;;  %v210_v17 = vld [vmem:[%s525_s3 + $0x50] sm:$0xff] }
  0xd4   :  { %v119_v60 = vsel %vm117_vm2, 1.0, %v405_v53  ;;  %336 = vmatprep.subr.mxu1 %v212_v15  ;;  %v209_v18 = vld [vmem:[%s525_s3 + $0x48] sm:$0xff]  ;;  %v204_v23 = vld [vmem:[%s525_s3 + $0x20] sm:$0xff] }
  0xd5   :  { %370 = vrcp.f32 %v124_v19  ;;  %v123_v21 = vmul.f32 0.3275911, %v121_v20  ;;  %v149_v25 = vsub.f32 0.0, %v121_v20  ;;  %v152_v27 = vmul.f32 1.442695, %v150_v24  ;;  %337 = vmatpush3.msra.mxu1 %v212_v15  ;;  %v208_v19 = vld [vmem:[%s525_s3 + $0x40] sm:$0xff] }
  0xd6   :  { %338 = vmatprep.subr.mxu1 %v211_v16  ;;  %v203_v24 = vld [vmem:[%s525_s3 + $0x18] sm:$0xff] }
  0xd7   :  { %v125_v22 = vadd.f32 1.0, %v123_v21  ;;  %v151_v28 = vmul.f32 %v149_v25, %v121_v20  ;;  %339 = vmatpush3.msra.mxu1 %v211_v16  ;;  %v207_v20 = vld [vmem:[%s525_s3 + $0x38] sm:$0xff]  ;;  %v206_v21 = vld [vmem:[%s525_s3 + $0x30] sm:$0xff] }
  0xd8   :  { %340 = vmatprep.subr.mxu1 %v210_v17  ;;  %v202_v25 = vld [vmem:[%s525_s3 + $0x10] sm:$0xff] }
  0xd9   :  { %372 = vrcp.f32 %v125_v22  ;;  %v154_v33 = vmul.f32 1.442695, %v151_v28  ;;  %341 = vmatpush3.msra.mxu1 %v210_v17  ;;  %v205_v22 = vld [vmem:[%s525_s3 + $0x28] sm:$0xff] }
  0xda   :  { %374 = vpow2.f32 %v152_v27  ;;  %342 = vmatprep.subr.mxu1 %v209_v18  ;;  %v200_v27 = vld [vmem:[%s525_s3] sm:$0xff] }
  0xdb   :  { %376 = vpow2.f32 %v154_v33  ;;  %343 = vmatpush3.msra.mxu1 %v209_v18 }
  0xdc   :  { %344 = vmatprep.subr.mxu1 %v208_v19 }
  0xdd   :  { %345 = vmatpush3.msra.mxu1 %v208_v19 }
  0xde   :  { %346 = vmatprep.subr.mxu1 %v207_v20 }
  0xdf   :  { %347 = vmatpush3.msra.mxu1 %v207_v20 }
  0xe0   :  { %348 = vmatprep.subr.mxu1 %v206_v21 }
  0xe1   :  { %349 = vmatpush3.msra.mxu1 %v206_v21 }
  0xe2   :  { %v371_v26 = vpop.eup %370  ;;  %350 = vmatprep.subr.mxu1 %v205_v22 }
  0xe3   :  { %v130_v29 = vmul.f32 1.0614054, %v371_v26  ;;  %351 = vmatpush3.msra.mxu1 %v205_v22 }
  0xe4   :  { %352 = vmatprep.subr.mxu1 %v204_v23 }
  0xe5   :  { %v132_v30 = vadd.f32 -1.4531521, %v130_v29  ;;  %353 = vmatpush3.msra.mxu1 %v204_v23 }
  0xe6   :  { %v373_v31 = vpop.eup %372  ;;  %354 = vmatprep.subr.mxu1 %v203_v24 }
  0xe7   :  { %v131_v32 = vmul.f32 1.0614054, %v373_v31  ;;  %v134_v34 = vmul.f32 %v371_v26, %v132_v30  ;;  %v375_v47 = vpop.eup %374  ;;  %355 = vmatpush3.msra.mxu1 %v203_v24 }
  0xe8   :  { %v377_v52 = vpop.eup %376  ;;  %356 = vmatprep.subr.mxu1 %v202_v25 }
  0xe9   :  { %v133_v35 = vadd.f32 -1.4531521, %v131_v32  ;;  %v136_v36 = vadd.f32 1.4214138, %v134_v34  ;;  %357 = vmatpush3.msra.mxu1 %v202_v25 }
  0xeb   :  { %v135_v37 = vmul.f32 %v373_v31, %v133_v35  ;;  %v138_v38 = vmul.f32 %v371_v26, %v136_v36  ;;  %v311_v35 = vld [vmem:[%s524_s2] ss:$0 sm:$0xff] }
  0xed   :  { %v137_v39 = vadd.f32 1.4214138, %v135_v37  ;;  %v140_v40 = vadd.f32 -0.28449672, %v138_v38 }
  0xef   :  { %v139_v41 = vmul.f32 %v373_v31, %v137_v39  ;;  %v142_v42 = vmul.f32 %v371_v26, %v140_v40 }
  0xf1   :  { %v141_v43 = vadd.f32 -0.28449672, %v139_v41  ;;  %v144_v44 = vadd.f32 0.2548296, %v142_v42 }
  0xf3   :  { %v143_v45 = vmul.f32 %v373_v31, %v141_v43  ;;  %v146_v46 = vmul.f32 %v371_v26, %v144_v44  ;;  %v201_v26 = vld [vmem:[%s525_s3 + $0x8] sm:$0xff]  ;;  %s406_s3 = smov [#allocation2]  }
  0xf4   :  { %358 = vmatprep.subr.mxu1 %v201_v26  ;;  %s298_s13 = sshll.u32 %s406_s3, 4  ;;  %s299_s13 = int_to_ptr.vmem [resolvable:$true] %s298_s13 }
  0xf5   :  { %v145_v48 = vadd.f32 0.2548296, %v143_v45  ;;  %v156_v49 = vmul.f32 %v375_v47, %v146_v46  ;;  %359 = vmatpush3.msra.mxu1 %v201_v26  ;;  %s382_s14 = scalar_lea.vmem %s299_s13, 256  ;;  %p387_p1 = scmp.lt.s32.totalorder %s299_s13, %s299_s13 }
  0xf6   :  { %360 = vmatprep.subr.mxu1 %v200_v27  ;;  %p383_p0 = scmp.ne.s32.totalorder %s299_s13, %s382_s14  ;;  %p388_p2 = scmp.lt.s32.totalorder %s382_s14, %s382_s14 }
  0xf7   :  { %v147_v50 = vmul.f32 %v373_v31, %v145_v48  ;;  %v158_v51 = vsub.f32 1.0, %v156_v49  ;;  %361 = vmatpush3.msra.mxu1 %v200_v27 }
  0xf8   :  { %p389_p3 = por %p388_p2, %p387_p1 }
  0xf9   :  { %v157_v55 = vmul.f32 %v377_v52, %v147_v50  ;;  %v160_v56 = vmul.f32 %v158_v51, %v118_v54 }
  0xfa   :  { %p390_p4 = pnand %p389_p3, %p383_p0 }
  0xfb   :  { %v159_v58 = vsub.f32 1.0, %v157_v55  ;;  %v162_v59 = vadd.f32 1.0, %v160_v56 }
  0xfd   :  { %v161_v61 = vmul.f32 %v159_v58, %v119_v60  ;;  %v164_v62 = vmul.f32 %v162_v59, %v112_v57 }
  0xff   :  { %v163_v0 = vadd.f32 1.0, %v161_v61  ;;  %v166_v1 = vmul.f32 %v164_v62, %v101_v11 }
 0x101   :  { %v165_v2 = vmul.f32 %v163_v0, %v113_v63  ;;  %168 = vadd.xlane.f32.xlu0 %v166_v1 }
 0x103   :  { %v167_v3 = vmul.f32 %v165_v2, %v107_v14 }
 0x105   :  { %170 = vadd.xlane.f32.xlu0 %v167_v3 }
 0x18a   :  { %v169_v7 = vpop.xlane.xlu0 %168 }
 0x18b   :  { %v173_v8 = vmul.f32 0.0078125, %v169_v7 }
 0x18d   :  { %v175_v9 = vsub.f32 %v166_v1, %v173_v8 }
 0x18e   :  { %v171_v10 = vpop.xlane.xlu0 %170 }
 0x18f   :  { %v174_v11 = vmul.f32 0.0078125, %v171_v10  ;;  %v177_v12 = vmul.f32 %v175_v9, %v175_v9 }
 0x191   :  { %v176_v13 = vsub.f32 %v167_v3, %v174_v11  ;;  %179 = vadd.xlane.f32.xlu1 %v177_v12 }
 0x193   :  { %v178_v14 = vmul.f32 %v176_v13, %v176_v13 }
 0x195   :  { %181 = vadd.xlane.f32.xlu1 %v178_v14 }
 0x21a   :  { %v180_v28 = vpop.xlane.xlu1 %179 }
 0x21b   :  { %v183_v29 = vmul.f32 0.0078125, %v180_v28 }
 0x21d   :  { %v185_v30 = vadd.f32 1e-05, %v183_v29 }
 0x21e   :  { %v182_v31 = vpop.xlane.xlu1 %181 }
 0x21f   :  { %378 = vrsqrt.f32 %v185_v30  ;;  %v184_v32 = vmul.f32 0.0078125, %v182_v31 }
 0x221   :  { %v186_v33 = vadd.f32 1e-05, %v184_v32 }
 0x223   :  { %380 = vrsqrt.f32 %v186_v33 }
 0x22c   :  { %v379_v34 = vpop.eup %378 }
 0x22d   :  { %v189_v36 = vmul.f32 %v379_v34, %v175_v9 }
 0x22f   :  { %v198_v37 = vmul.f32 %v311_v35, %v189_v36 }
 0x230   :  { %v381_v38 = vpop.eup %380 }
 0x231   :  { %v190_v39 = vmul.f32 %v381_v38, %v176_v13  ;;  %362 = vmatprep.mubr.f32.mxu1 %v198_v37 }
 0x233   :  { %v199_v40 = vmul.f32 %v311_v35, %v190_v39 }
 0x235   :  { %363 = vmatmul.mubr.f32.vlgmr.msra.gmra.mxu1 %v199_v40 }
 0x2f5   :  { %v364_v41 = vpop.f32.mrf.mxu1 }
 0x2f6   :  { %292 = vst.msk [vmem:[#allocation2 + $0x8] sm:$0xff] %vm28_vm0, %v364_v41 }
 0x2f7   :  { %v282_v42 = vpop.f32.mrf.mxu1 }
 0x2f8   :  { %291 = vst.msk [vmem:[#allocation2] sm:$0xff] %vm28_vm0, %v282_v42 }
 0x2f9   :  { %393 = shalt.err (!%p390_p4)
}
 0x2fa   :  { %s407_s2 = smov 128   ;;  %s408_s15 = smov 8  }
 0x2fb   :  { %304 = dma.vmem_to_hbm [thread:$0]  %s299_s13, 256, %s526_s4, [#allocation3], %s407_s2, %s407_s2, %s408_s15  }
 0x2fc   :  { %402 = dma.done.wait [#allocation3], 256  }
 0x2fd   :  { %403 = vsyncadd [#allocation3], 4294967040 }
 0x2fe   :  { %308 = vsyncpa [#allocation3], 1 }

</bundles_post_ra>
